<compile_context>
chip_gen: v7x
topology: tpu7x:2x2x1
jax: 0.10.0
libtpu: 0.0.40
codegen_flags: <defaults>
</compile_context>

<pallas_src>
import functools
import math
from typing import List, Optional, Sequence

import jax
import jax.numpy as jnp
from jax.experimental import pallas as pl
from jax.experimental.pallas import tpu as pltpu


_LANE = 128            # hidden feature dims padded to multiples of the 128-lane vreg width
_SUBLANE = 8           # f32 sublane count: batch tiles are multiples of this
_MAX_BATCH_TILE = 1024  # rows per grid step (amortizes ~0.35us/step and MXU RHS pushes)


def _round_up(v: int, m: int) -> int:
    return ((v + m - 1) // m) * m


def _device_kind() -> str:
    try:
        return jax.devices()[0].device_kind.lower()
    except Exception:
        return ""


def _vmem_limit_bytes() -> int:
    """Generation-aware scoped-VMEM limit with headroom for Mosaic scratch."""
    cap = 0
    try:
        cap = int(getattr(pltpu.get_tpu_info(), "vmem_capacity_bytes", 0))
    except Exception:
        cap = 0
    if cap <= 0:
        kind = _device_kind()
        cap = 64 * 1024 * 1024 if "v7" in kind else 128 * 1024 * 1024
    return max(16 * 1024 * 1024, min((cap * 3) // 4, 100 * 1024 * 1024))


def _tensorcores_per_chip() -> int:
    kind = _device_kind()
    return 2 if any(tag in kind for tag in ("v7", "v4", "v5p")) else 1


def _resident_spec(shape):
    """Constant-index weight block, single-buffered when the API supports it."""
    index_map = lambda i: (0, 0)
    try:
        return pl.BlockSpec(shape, index_map, pipeline_mode=pl.Buffered(1))
    except Exception:
        return pl.BlockSpec(shape, index_map)


def _apply_activation(y, activation: Optional[str]):
    # Activation math stays float32 (matches PyTorch; v5e VPU/EUP have no bf16).
    if activation == "sigmoid":
        return jax.nn.sigmoid(y)
    if activation == "relu":
        return jnp.maximum(y, 0.0)
    if activation == "l_relu":
        # torch.nn.functional.leaky_relu default negative_slope = 0.01
        return jnp.where(y >= 0.0, y, 0.01 * y)
    if activation == "softplus":
        # torch.nn.functional.softplus default beta=1, threshold=20
        return jnp.where(y > 20.0, y, jnp.log1p(jnp.exp(jnp.minimum(y, 20.0))))
    return y


def _fused_mlp_kernel(*refs, num_layers: int,
                      hidden_activation: Optional[str],
                      out_activation: Optional[str],
                      compute_dtype):
    """refs = (x_ref, w0_ref, ..., w{L-1}_ref, o_ref); all tiles live in VMEM."""
    x_ref = refs[0]
    w_refs = refs[1:1 + num_layers]
    o_ref = refs[1 + num_layers]

    h = x_ref[...].astype(jnp.float32)
    for li in range(num_layers):  # statically unrolled; no HBM round trips
        y = jnp.dot(h.astype(compute_dtype), w_refs[li][...],
                    preferred_element_type=jnp.float32)
        act = hidden_activation if li < num_layers - 1 else out_activation
        h = _apply_activation(y, act)
    o_ref[...] = h.astype(o_ref.dtype)


def _choose_batch_tiling(batch: int, vmem_limit: int, weight_bytes: int,
                         per_row_bytes: int, n_cores: int):
    """Pick (tile_rows, padded_batch) so padding waste is bounded, the VMEM
    budget holds, and 2-TC chips get a grid of at least 2 parallel steps."""
    b_pad8 = _round_up(max(batch, 1), _SUBLANE)

    if vmem_limit > weight_bytes and per_row_bytes > 0:
        rows_budget = (vmem_limit - weight_bytes) // per_row_bytes
    else:
        # TODO(synk): if resident weights alone exceed the VMEM budget, fall back
        # to streaming weights (emit_pipeline over layers / K-tiling).
        rows_budget = _SUBLANE
    tb_cap = max(_SUBLANE, (rows_budget // _SUBLANE) * _SUBLANE)
    tb_cap = min(tb_cap, _MAX_BATCH_TILE)

    n_tiles = pl.cdiv(b_pad8, tb_cap)
    if n_cores >= 2 and n_tiles < 2 and b_pad8 >= 2 * _SUBLANE:
        n_tiles = 2  # shard the 'parallel' batch axis across both TensorCores
    tb = _round_up(pl.cdiv(b_pad8, n_tiles), _SUBLANE)
    return tb, tb * n_tiles


def fused_mlp_forward(x, padded_weights: Sequence[jax.Array],
                      hidden_activation: Optional[str],
                      out_activation: Optional[str],
                      out_features: int,
                      compute_dtype=jnp.bfloat16):
    """x: (B, in_features).  padded_weights[i]: (P_i, P_{i+1}) with hidden dims
    zero-padded to 128 multiples; P_0 = in_features, P_L = out_features.
    Returns (B, out_features)."""
    B, in_f = x.shape
    num_layers = len(padded_weights)
    p_in = padded_weights[0].shape[0]
    p_out = padded_weights[-1].shape[1]
    assert p_in == in_f and p_out == out_features

    vmem_limit = _vmem_limit_bytes()
    cdt_bytes = jnp.dtype(compute_dtype).itemsize
    weight_bytes = sum(w.size * w.dtype.itemsize for w in padded_weights)
    # Per-batch-row VMEM: double-buffered x/out tiles + unrolled-loop intermediates.
    per_row_bytes = 2 * in_f * x.dtype.itemsize + 2 * p_out * x.dtype.itemsize
    for w in padded_weights:
        per_row_bytes += w.shape[1] * 4          # f32 layer output / activation
        per_row_bytes += w.shape[0] * cdt_bytes  # cast LHS fed to the MXU

    tb, b_pad = _choose_batch_tiling(B, vmem_limit, weight_bytes, per_row_bytes,
                                     _tensorcores_per_chip())

    # Batch padding only (feature dims are already exact).
    x_pad = x if b_pad == B else jnp.zeros((b_pad, in_f), dtype=x.dtype).at[:B].set(x)

    grid = (b_pad // tb,)
    in_specs = [pl.BlockSpec((tb, in_f), lambda i: (i, 0))]
    for w in padded_weights:
        in_specs.append(_resident_spec(w.shape))
    out_spec = pl.BlockSpec((tb, p_out), lambda i: (i, 0))

    # Advisory cost estimate for the XLA scheduler.
    flops = 0
    transcendentals = 0
    bytes_accessed = (x_pad.size * x_pad.dtype.itemsize
                      + b_pad * p_out * x.dtype.itemsize + weight_bytes)
    for li, w in enumerate(padded_weights):
        k, n = w.shape
        flops += 2 * b_pad * k * n
        act = hidden_activation if li < num_layers - 1 else out_activation
        if act == "sigmoid":
            transcendentals += b_pad * n
        elif act == "softplus":
            transcendentals += 2 * b_pad * n

    kernel = functools.partial(
        _fused_mlp_kernel, num_layers=num_layers,
        hidden_activation=hidden_activation, out_activation=out_activation,
        compute_dtype=compute_dtype)

    out_pad = pl.pallas_call(
        kernel,
        out_shape=jax.ShapeDtypeStruct((b_pad, p_out), x.dtype),
        grid_spec=pltpu.PrefetchScalarGridSpec(
            num_scalar_prefetch=0,
            grid=grid,
            in_specs=in_specs,
            out_specs=out_spec,
        ),
        compiler_params=pltpu.CompilerParams(
            dimension_semantics=("parallel",),   # batch axis shards across TCs
            vmem_limit_bytes=vmem_limit,
        ),
        cost_estimate=pl.CostEstimate(
            flops=flops, transcendentals=transcendentals,
            bytes_accessed=bytes_accessed),
    )(x_pad, *padded_weights)

    return out_pad if b_pad == B else out_pad[:B]


class PallasFeedforwardNN:
    """JAX/Pallas mirror of TorchFeedforwardNN's forward pass (bias-free Linears)."""

    def __init__(self, neurons_list: List[int],
                 hidden_activation: Optional[str] = None,
                 out_activation: Optional[str] = None,
                 key=None,
                 compute_dtype=jnp.bfloat16):
        # compute_dtype=bf16 feeds the MXU in bf16 on every generation (f32
        # accumulation via preferred_element_type; f32 activation math).
        assert len(neurons_list) >= 2
        if key is None:
            key = jax.random.PRNGKey(0)
        self.neurons_list = list(neurons_list)
        self.hidden_activation = hidden_activation
        self.out_activation = out_activation
        self.compute_dtype = compute_dtype

        dims = list(neurons_list)
        # Only internal (hidden) dims are lane-padded; in/out dims stay exact.
        padded = [dims[0]] + [_round_up(d, _LANE) for d in dims[1:-1]] + [dims[-1]]

        self.weights_t = []        # unpadded (in, out) f32 weights (reference view)
        self.padded_weights = []   # padded compute_dtype copies fed to the kernel
        for i in range(1, len(dims)):
            fan_in, fan_out = dims[i - 1], dims[i]
            key, sub = jax.random.split(key)
            bound = 1.0 / math.sqrt(fan_in)  # PyTorch nn.Linear default init
            w_t = jax.random.uniform(sub, (fan_in, fan_out), dtype=jnp.float32,
                                     minval=-bound, maxval=bound)
            self.weights_t.append(w_t)
            p_i, p_o = padded[i - 1], padded[i]
            w_pad = jnp.zeros((p_i, p_o), dtype=compute_dtype)
            w_pad = w_pad.at[:fan_in, :fan_out].set(w_t.astype(compute_dtype))
            self.padded_weights.append(w_pad)

        self._forward = jax.jit(functools.partial(
            fused_mlp_forward,
            hidden_activation=hidden_activation,
            out_activation=out_activation,
            out_features=neurons_list[-1],
            compute_dtype=compute_dtype))

    def __call__(self, x):
        return self._forward(x, tuple(self.padded_weights))


if __name__ == "__main__":
    key = jax.random.PRNGKey(0)
    neurons_list = [16, 32, 32, 8]   # input 16 -> hidden 32 -> hidden 32 -> output 8
    batch = 2

    key, xkey, wkey = jax.random.split(key, 3)
    x = jax.random.normal(xkey, (batch, neurons_list[0]), dtype=jnp.float32)

    # Exact-precision model for a tight numerical check against the reference.
    model_f32 = PallasFeedforwardNN(
        neurons_list, hidden_activation="relu", out_activation="sigmoid",
        key=wkey, compute_dtype=jnp.float32)
    y32 = jax.block_until_ready(model_f32(x))

    # Plain-JAX reference using the unpadded weights.
    ref = x
    for w_t in model_f32.weights_t[:-1]:
        ref = jnp.maximum(ref @ w_t, 0.0)
    ref = jax.nn.sigmoid(ref @ model_f32.weights_t[-1])

    assert y32.shape == (batch, neurons_list[-1])
    assert jnp.allclose(y32, ref, atol=1e-5, rtol=1e-5)

    # Default bf16-MXU model (same weights): looser tolerance, expected precision tradeoff.
    model_bf16 = PallasFeedforwardNN(
        neurons_list, hidden_activation="relu", out_activation="sigmoid", key=wkey)
    y16 = jax.block_until_ready(model_bf16(x))
    assert y16.shape == (batch, neurons_list[-1])
    assert jnp.allclose(y16, ref, atol=2e-2, rtol=2e-2)

    print("KERNEL_OK")
</pallas_src>

<mosaic_0001>
module attributes {stable_mosaic.version = 11 : i64} {
  func.func @_fused_mlp_kernel(%arg0: i32, %arg1: memref<8x16xf32, #tpu.memory_space<vmem>>, %arg2: memref<16x128xf32, #tpu.memory_space<vmem>>, %arg3: memref<128x128xf32, #tpu.memory_space<vmem>>, %arg4: memref<128x8xf32, #tpu.memory_space<vmem>>, %arg5: memref<8x8xf32, #tpu.memory_space<vmem>>) attributes {dimension_semantics = [#tpu.dimension_semantics<parallel>], iteration_bounds = array<i64: 1>, scalar_prefetch = 0 : i64, scratch_operands = 0 : i64, tpu.core_type = #tpu.core_type<tc>, window_params = [{transform_indices = @transform_0, window_bounds = array<i64: 8, 16>}, {pipeline_mode = #tpu.pipeline_mode<synchronous>, transform_indices = @transform_1, window_bounds = array<i64: 16, 128>}, {pipeline_mode = #tpu.pipeline_mode<synchronous>, transform_indices = @transform_2, window_bounds = array<i64: 128, 128>}, {pipeline_mode = #tpu.pipeline_mode<synchronous>, transform_indices = @transform_3, window_bounds = array<i64: 128, 8>}, {transform_indices = @transform_4, window_bounds = array<i64: 8, 8>}]} {
    %c0 = arith.constant 0 : index
    %c0_0 = arith.constant 0 : index
    %0 = vector.load %arg1[%c0, %c0_0] : memref<8x16xf32, #tpu.memory_space<vmem>>, vector<8x16xf32>
    %c0_1 = arith.constant 0 : index
    %c0_2 = arith.constant 0 : index
    %1 = vector.load %arg2[%c0_1, %c0_2] : memref<16x128xf32, #tpu.memory_space<vmem>>, vector<16x128xf32>
    %cst = arith.constant dense<0.000000e+00> : vector<8x128xf32>
    %2 = tpu.matmul %0, %1, %cst {dimension_numbers = #tpu.dot_dimension_numbers<[1], [0], [0], [1], [0, 0, 1, 1], [], []>} : vector<8x16xf32>, vector<16x128xf32>, vector<8x128xf32> -> vector<8x128xf32>
    %cst_3 = arith.constant 0.000000e+00 : f32
    %3 = vector.broadcast %cst_3 : f32 to vector<8x128xf32>
    %4 = arith.maximumf %2, %3 : vector<8x128xf32>
    %c0_4 = arith.constant 0 : index
    %c0_5 = arith.constant 0 : index
    %5 = vector.load %arg3[%c0_4, %c0_5] : memref<128x128xf32, #tpu.memory_space<vmem>>, vector<128x128xf32>
    %cst_6 = arith.constant dense<0.000000e+00> : vector<8x128xf32>
    %6 = tpu.matmul %4, %5, %cst_6 {dimension_numbers = #tpu.dot_dimension_numbers<[1], [0], [0], [1], [0, 0, 1, 1], [], []>} : vector<8x128xf32>, vector<128x128xf32>, vector<8x128xf32> -> vector<8x128xf32>
    %cst_7 = arith.constant 0.000000e+00 : f32
    %7 = vector.broadcast %cst_7 : f32 to vector<8x128xf32>
    %8 = arith.maximumf %6, %7 : vector<8x128xf32>
    %c0_8 = arith.constant 0 : index
    %c0_9 = arith.constant 0 : index
    %9 = vector.load %arg4[%c0_8, %c0_9] : memref<128x8xf32, #tpu.memory_space<vmem>>, vector<128x8xf32>
    %cst_10 = arith.constant dense<0.000000e+00> : vector<8x8xf32>
    %10 = tpu.matmul %8, %9, %cst_10 {dimension_numbers = #tpu.dot_dimension_numbers<[1], [0], [0], [1], [0, 0, 1, 1], [], []>} : vector<8x128xf32>, vector<128x8xf32>, vector<8x8xf32> -> vector<8x8xf32>
    %11 = arith.negf %10 : vector<8x8xf32>
    %12 = math.exp %11 : vector<8x8xf32>
    %cst_11 = arith.constant 1.000000e+00 : f32
    %13 = vector.broadcast %cst_11 : f32 to vector<8x8xf32>
    %14 = arith.addf %13, %12 : vector<8x8xf32>
    %15 = arith.divf %13, %14 : vector<8x8xf32>
    %c0_12 = arith.constant 0 : index
    %c0_13 = arith.constant 0 : index
    %16 = vector.load %arg5[%c0_12, %c0_13] : memref<8x8xf32, #tpu.memory_space<vmem>>, vector<8x8xf32>
    tpu.vector_store %arg5[%c0_12, %c0_13], %15 {strides = array<i32>} : memref<8x8xf32, #tpu.memory_space<vmem>>, vector<8x8xf32>,
    return
  }
  func.func @transform_0(%arg0: i32) -> (i32, i32) {
    %c0_i32 = arith.constant 0 : i32
    %c0_i32_0 = arith.constant 0 : i32
    return %arg0, %c0_i32 : i32, i32
  }
  func.func @transform_1(%arg0: i32) -> (i32, i32) {
    %c0_i32 = arith.constant 0 : i32
    %c0_i32_0 = arith.constant 0 : i32
    %c0_i32_1 = arith.constant 0 : i32
    return %c0_i32, %c0_i32_0 : i32, i32
  }
  func.func @transform_2(%arg0: i32) -> (i32, i32) {
    %c0_i32 = arith.constant 0 : i32
    %c0_i32_0 = arith.constant 0 : i32
    %c0_i32_1 = arith.constant 0 : i32
    return %c0_i32, %c0_i32_0 : i32, i32
  }
  func.func @transform_3(%arg0: i32) -> (i32, i32) {
    %c0_i32 = arith.constant 0 : i32
    %c0_i32_0 = arith.constant 0 : i32
    %c0_i32_1 = arith.constant 0 : i32
    return %c0_i32, %c0_i32_0 : i32, i32
  }
  func.func @transform_4(%arg0: i32) -> (i32, i32) {
    %c0_i32 = arith.constant 0 : i32
    %c0_i32_0 = arith.constant 0 : i32
    return %arg0, %c0_i32 : i32, i32
  }
}

</mosaic_0001>

<bundles_post_ra>
// kernel: fused_mlp_forward.1
= control target key start
LH: loop header
LB: loop body
LE: loop exit
PB: predicated region body
PF: predicated region fallthrough
CT: control target
= control target key end

     0   :  { %9 = vsyncpa [#allocation3], 0  ;;  %s770_s0 = inlined_call_operand.hbm [shape: f32[8,16], index: 0, kind: input, shape index: {}]   ;;  %s771_s1 = inlined_call_operand.hbm [shape: f32[16,128], index: 1, kind: input, shape index: {}]   ;;  %s772_s2 = inlined_call_operand.hbm [shape: f32[128,128], index: 2, kind: input, shape index: {}]   ;;  %s773_s3 = inlined_call_operand.hbm [shape: f32[128,8], index: 3, kind: input, shape index: {}]   ;;  %s774_s4 = inlined_call_operand.hbm [shape: f32[8,8], index: 4, kind: output, shape index: {}]  }
   0x1   :  { %10 = vsyncpa [#allocation6], 0 }
   0x2   :  { %11 = vsyncpa [#allocation9], 0 }
   0x3   :  { %12 = vsyncpa [#allocation4], 0  ;;  %s646_s15 = smov [#allocation5]   ;;  %s528_s19 = scalar_lea.hbm %s771_s1, 256 }
   0x4   :  { %s28_s16 = sshll.u32 %s646_s15, 4  ;;  %p529_p0 = scmp.ne.s32.totalorder %s771_s1, %s528_s19  ;;  %s29_s16 = int_to_ptr.vmem [resolvable:$true] %s28_s16 }
   0x5   :  { %p532_p1 = scmp.lt.u32.totalorder %s528_s19, %s771_s1 }
   0x7   :  { %p534_p2 = pnand %p532_p1, %p529_p0 }
   0x9   :  { %537 = shalt.err (!%p534_p2)
}
   0xa   :  { %s538_s24 = scalar_lea.vmem %s29_s16, 256  ;;  %p543_p4 = scmp.lt.s32.totalorder %s29_s16, %s29_s16 }
   0xb   :  { %p539_p3 = scmp.ne.s32.totalorder %s29_s16, %s538_s24  ;;  %p544_p5 = scmp.lt.s32.totalorder %s538_s24, %s538_s24 }
   0xd   :  { %p545_p6 = por %p544_p5, %p543_p4 }
   0xf   :  { %p546_p7 = pnand %p545_p6, %p539_p3 }
  0x11   :  { %549 = shalt.err (!%p546_p7)
}
  0x12   :  { %s647_s25 = smov 128   ;;  %s648_s26 = smov 8  }
  0x13   :  { %34 = dma.hbm_to_vmem [thread:$0]  %s771_s1, 256, %s29_s16, [#allocation6], %s647_s25, %s647_s25, %s648_s26  }
  0x14   :  { %s649_s29 = smov [#allocation2]   ;;  %s650_s5 = smov [#allocation7]  }
  0x15   :  { %s19_s30 = sshll.u32 %s649_s29, 4  ;;  %s40_s6 = sshll.u32 %s650_s5, 4  ;;  %s20_s30 = int_to_ptr.vmem [resolvable:$true] %s19_s30  ;;  %s41_s6 = int_to_ptr.vmem [resolvable:$true] %s40_s6 }
  0x16   :  { %s550_s9 = scalar_lea.hbm %s770_s0, 128 }
  0x17   :  { %p551_p8 = scmp.ne.s32.totalorder %s770_s0, %s550_s9  ;;  %p554_p9 = scmp.lt.u32.totalorder %s550_s9, %s770_s0 }
  0x19   :  { %p556_p10 = pnand %p554_p9, %p551_p8 }
  0x1b   :  { %559 = shalt.err (!%p556_p10)
}
  0x1c   :  { %s560_s1 = scalar_lea.vmem %s20_s30, 128  ;;  %p565_p12 = scmp.lt.s32.totalorder %s20_s30, %s20_s30 }
  0x1d   :  { %p561_p11 = scmp.ne.s32.totalorder %s20_s30, %s560_s1  ;;  %p566_p13 = scmp.lt.s32.totalorder %s560_s1, %s560_s1 }
  0x1f   :  { %p567_p0 = por %p566_p13, %p565_p12 }
  0x21   :  { %p568_p1 = pnand %p567_p0, %p561_p11 }
  0x23   :  { %571 = shalt.err (!%p568_p1)
}
  0x24   :  { %22 = dma.hbm_to_vmem [thread:$0]  %s770_s0, 128, %s20_s30, [#allocation3]  }
  0x25   :  { %s572_s18 = scalar_lea.hbm %s772_s2, 2048 }
  0x26   :  { %p573_p2 = scmp.ne.s32.totalorder %s772_s2, %s572_s18  ;;  %p576_p3 = scmp.lt.u32.totalorder %s572_s18, %s772_s2 }
  0x28   :  { %p578_p4 = pnand %p576_p3, %p573_p2 }
  0x2a   :  { %581 = shalt.err (!%p578_p4)
}
  0x2b   :  { %s582_s23 = scalar_lea.vmem %s41_s6, 2048  ;;  %p587_p6 = scmp.lt.s32.totalorder %s41_s6, %s41_s6 }
  0x2c   :  { %p583_p5 = scmp.ne.s32.totalorder %s41_s6, %s582_s23  ;;  %p588_p7 = scmp.lt.s32.totalorder %s582_s23, %s582_s23 }
  0x2e   :  { %p589_p8 = por %p588_p7, %p587_p6 }
  0x30   :  { %p590_p9 = pnand %p589_p8, %p583_p5 }
  0x32   :  { %593 = shalt.err (!%p590_p9)
}
  0x33   :  { %46 = dma.hbm_to_vmem [thread:$0]  %s772_s2, 2048, %s41_s6, [#allocation6], %s647_s25, %s647_s25, %s648_s26  }
  0x34   :  { %s651_s27 = smov [#allocation8]   ;;  %s594_s5 = scalar_lea.hbm %s773_s3, 2048 }
  0x35   :  { %s52_s28 = sshll.u32 %s651_s27, 4  ;;  %p595_p10 = scmp.ne.s32.totalorder %s773_s3, %s594_s5  ;;  %s53_s28 = int_to_ptr.vmem [resolvable:$true] %s52_s28 }
  0x36   :  { %p598_p11 = scmp.lt.u32.totalorder %s594_s5, %s773_s3 }
  0x38   :  { %p600_p12 = pnand %p598_p11, %p595_p10 }
  0x3a   :  { %603 = shalt.err (!%p600_p12)
}
  0x3b   :  { %s604_s11 = scalar_lea.vmem %s53_s28, 2048  ;;  %p609_p0 = scmp.lt.s32.totalorder %s53_s28, %s53_s28 }
  0x3c   :  { %p605_p13 = scmp.ne.s32.totalorder %s53_s28, %s604_s11  ;;  %p610_p1 = scmp.lt.s32.totalorder %s604_s11, %s604_s11 }
  0x3e   :  { %p611_p2 = por %p610_p1, %p609_p0 }
  0x40   :  { %p612_p3 = pnand %p611_p2, %p605_p13 }
  0x42   :  { %615 = shalt.err (!%p612_p3)
}
  0x43   :  { %58 = dma.hbm_to_vmem [thread:$0]  %s773_s3, 2048, %s53_s28, [#allocation9], %s647_s25, %s647_s25, %s648_s26  }
  0x44   :  { %638 = dma.done.wait [#allocation3], 128  }
  0x45   :  { %639 = vsyncadd [#allocation3], 4294967168 }
  0x46   :  { %640 = dma.done.wait [#allocation6], 2304  }
  0x47   :  { %641 = vsyncadd [#allocation6], 4294964992 }
  0x48   :  { %642 = dma.done.wait [#allocation9], 2048  }
  0x49   :  { %643 = vsyncadd [#allocation9], 4294965248  ;;  %v652_v0 = vmov 0.0|0.0   ;;  %vm653_vm0 = vmmov 0   ;;  %v654_v1 = vmov 0.0   ;;  %v72_v2 = vld [vmem:[#allocation5] sm:$0xff] }
  0x4a   :  { %463 = vmatprep.subr.bf16.mxu0 %v652_v0  ;;  %390 = vmatprep.mubr.msk.f32.mxu0 %vm653_vm0, %v654_v1  ;;  %v73_v3 = vld [vmem:[#allocation5 + $0x8] sm:$0xff]  ;;  %v149_v5 = vld [vmem:[#allocation7] sm:$0xff]  ;;  %v150_v6 = vld [vmem:[#allocation7 + $0x8] sm:$0xff]  ;;  %vm74_vm1 = vcmask 130048   ;;  %s655_s3 = smov [#allocation10]   ;;  %vm328_vm2 = vcmask 64512  }
  0x4b   :  { %466 = vmatprep.subr.bf16.mxu1 %v652_v0  ;;  %425 = vmatprep.mubr.msk.f32.mxu1 %vm653_vm0, %v654_v1  ;;  %v464_v4 = vpack.c.bf16 %v73_v3, %v72_v2  ;;  %v151_v7 = vld [vmem:[#allocation7 + $0x10] sm:$0xff]  ;;  %v467_v8 = vpack.c.bf16 %v150_v6, %v149_v5  ;;  %v152_v9 = vld [vmem:[#allocation7 + $0x18] sm:$0xff]  ;;  %v71_v10 = vld [vmem:[#allocation2] sm:$0xff]  ;;  %s336_s25 = sshll.u32 %s655_s3, 4  ;;  %s337_s25 = int_to_ptr.vmem [resolvable:$true] %s336_s25 }
  0x4c   :  { %v470_v11 = vpack.c.bf16 %v152_v9, %v151_v7  ;;  %v153_v12 = vld [vmem:[#allocation7 + $0x20] sm:$0xff]  ;;  %v154_v13 = vld [vmem:[#allocation7 + $0x28] sm:$0xff]  ;;  %v155_v15 = vld [vmem:[#allocation7 + $0x30] sm:$0xff]  ;;  %s616_s26 = scalar_lea.vmem %s337_s25, 128  ;;  %p621_p5 = scmp.lt.s32.totalorder %s337_s25, %s337_s25 }
  0x4d   :  { %465 = vmatpush3.bf16.msra.mxu0 %v464_v4  ;;  %468 = vmatpush3.bf16.msra.mxu1 %v467_v8  ;;  %v473_v14 = vpack.c.bf16 %v154_v13, %v153_v12  ;;  %v156_v16 = vld [vmem:[#allocation7 + $0x38] sm:$0xff]  ;;  %v157_v18 = vld [vmem:[#allocation7 + $0x40] sm:$0xff]  ;;  %v158_v19 = vld [vmem:[#allocation7 + $0x48] sm:$0xff]  ;;  %p617_p4 = scmp.ne.s32.totalorder %s337_s25, %s616_s26  ;;  %p622_p6 = scmp.lt.s32.totalorder %s616_s26, %s616_s26 }
  0x4e   :  { %490 = vmatprep.subr.bf16.mxu0 %v652_v0  ;;  %469 = vmatprep.subr.bf16.mxu1 %v652_v0  ;;  %v476_v17 = vpack.c.bf16 %v156_v16, %v155_v15  ;;  %v479_v20 = vpack.c.bf16 %v158_v19, %v157_v18  ;;  %v159_v21 = vld [vmem:[#allocation7 + $0x50] sm:$0xff]  ;;  %v160_v22 = vld [vmem:[#allocation7 + $0x58] sm:$0xff]  ;;  %v161_v24 = vld [vmem:[#allocation7 + $0x60] sm:$0xff] }
  0x4f   :  { %v482_v23 = vpack.c.bf16 %v160_v22, %v159_v21  ;;  %v162_v25 = vld [vmem:[#allocation7 + $0x68] sm:$0xff]  ;;  %v163_v27 = vld [vmem:[#allocation7 + $0x70] sm:$0xff]  ;;  %v164_v28 = vld [vmem:[#allocation7 + $0x78] sm:$0xff]  ;;  %p623_p7 = por %p622_p6, %p621_p5 }
  0x50   :  { %391 = vmatmul.mubr.msk.f32.vlgmr.msra.gmra.mrb[0].mxu0 %vm74_vm1, %v71_v10  ;;  %v485_v26 = vpack.c.bf16 %v162_v25, %v161_v24  ;;  %v488_v29 = vpack.c.bf16 %v164_v28, %v163_v27  ;;  %v236_v30 = vld [vmem:[#allocation8] sm:$0xff]  ;;  %v237_v31 = vld [vmem:[#allocation8 + $0x8] sm:$0xff]  ;;  %v238_v32 = vld [vmem:[#allocation8 + $0x10] sm:$0xff] }
  0x51   :  { %460 = vmatprep.mubr.msk.f32.mxu0 %vm653_vm0, %v654_v1  ;;  %471 = vmatpush3.bf16.msra.mxu1 %v470_v11  ;;  %v491_v33 = vpack.c.bf16 %v237_v31, %v236_v30  ;;  %v239_v34 = vld [vmem:[#allocation8 + $0x18] sm:$0xff]  ;;  %v240_v36 = vld [vmem:[#allocation8 + $0x20] sm:$0xff]  ;;  %v241_v37 = vld [vmem:[#allocation8 + $0x28] sm:$0xff]  ;;  %p624_p8 = pnand %p623_p7, %p617_p4 }
  0x52   :  { %472 = vmatprep.subr.bf16.mxu1 %v652_v0  ;;  %v494_v35 = vpack.c.bf16 %v239_v34, %v238_v32  ;;  %v497_v38 = vpack.c.bf16 %v241_v37, %v240_v36  ;;  %v242_v39 = vld [vmem:[#allocation8 + $0x30] sm:$0xff]  ;;  %v243_v40 = vld [vmem:[#allocation8 + $0x38] sm:$0xff]  ;;  %v244_v42 = vld [vmem:[#allocation8 + $0x40] sm:$0xff] }
  0x53   :  { %492 = vmatpush3.bf16.msra.mxu0 %v491_v33  ;;  %v500_v41 = vpack.c.bf16 %v243_v40, %v242_v39  ;;  %v245_v43 = vld [vmem:[#allocation8 + $0x48] sm:$0xff]  ;;  %v246_v45 = vld [vmem:[#allocation8 + $0x50] sm:$0xff]  ;;  %v247_v46 = vld [vmem:[#allocation8 + $0x58] sm:$0xff] }
  0x54   :  { %493 = vmatprep.subr.bf16.mxu0 %v652_v0  ;;  %v503_v44 = vpack.c.bf16 %v245_v43, %v244_v42  ;;  %v506_v47 = vpack.c.bf16 %v247_v46, %v246_v45  ;;  %v248_v48 = vld [vmem:[#allocation8 + $0x60] sm:$0xff]  ;;  %v249_v49 = vld [vmem:[#allocation8 + $0x68] sm:$0xff]  ;;  %v250_v54 = vld [vmem:[#allocation8 + $0x70] sm:$0xff] }
  0x55   :  { %474 = vmatpush3.bf16.msra.mxu1 %v473_v14  ;;  %v509_v50 = vpack.c.bf16 %v249_v49, %v248_v48  ;;  %v251_v55 = vld [vmem:[#allocation8 + $0x78] sm:$0xff] }
  0x56   :  { %475 = vmatprep.subr.bf16.mxu1 %v652_v0  ;;  %v512_v56 = vpack.c.bf16 %v251_v55, %v250_v54 }
  0x57   :  { %495 = vmatpush3.bf16.msra.mxu0 %v494_v35 }
  0x58   :  { %496 = vmatprep.subr.bf16.mxu0 %v652_v0 }
  0x59   :  { %477 = vmatpush3.bf16.msra.mxu1 %v476_v17 }
  0x5a   :  { %478 = vmatprep.subr.bf16.mxu1 %v652_v0 }
  0x5b   :  { %498 = vmatpush3.bf16.msra.mxu0 %v497_v38 }
  0x5c   :  { %499 = vmatprep.subr.bf16.mxu0 %v652_v0 }
  0x5d   :  { %480 = vmatpush3.bf16.msra.mxu1 %v479_v20 }
  0x5e   :  { %481 = vmatprep.subr.bf16.mxu1 %v652_v0 }
  0x5f   :  { %501 = vmatpush3.bf16.msra.mxu0 %v500_v41 }
  0x60   :  { %502 = vmatprep.subr.bf16.mxu0 %v652_v0 }
  0x61   :  { %483 = vmatpush3.bf16.msra.mxu1 %v482_v23 }
  0x62   :  { %484 = vmatprep.subr.bf16.mxu1 %v652_v0 }
  0x63   :  { %504 = vmatpush3.bf16.msra.mxu0 %v503_v44 }
  0x64   :  { %505 = vmatprep.subr.bf16.mxu0 %v652_v0 }
  0x65   :  { %486 = vmatpush3.bf16.msra.mxu1 %v485_v26 }
  0x66   :  { %487 = vmatprep.subr.bf16.mxu1 %v652_v0 }
  0x67   :  { %507 = vmatpush3.bf16.msra.mxu0 %v506_v47 }
  0x68   :  { %508 = vmatprep.subr.bf16.mxu0 %v652_v0 }
  0x69   :  { %489 = vmatpush3.bf16.msra.mxu1 %v488_v29 }
  0x6b   :  { %510 = vmatpush3.bf16.msra.mxu0 %v509_v50 }
  0x6c   :  { %511 = vmatprep.subr.bf16.mxu0 %v652_v0 }
  0x6f   :  { %513 = vmatpush3.bf16.msra.mxu0 %v512_v56 }
 0x123   :  { %v144_v51 = vpop.f32.mrb[0].mxu0 }
 0x124   :  { %v148_v52 = vmax.f32 %v144_v51, 0.0  ;;  %v392_v53 = vpop.f32.mrb[1].mxu0 }
 0x126   :  { %426 = vmatmul.mubr.f32.vlgmr.msra.gmra.mrb[0].mxu1 %v148_v52 }
 0x1f9   :  { %v231_v57 = vpop.f32.mrb[0].mxu1 }
 0x1fa   :  { %v235_v58 = vmax.f32 %v231_v57, 0.0  ;;  %v427_v59 = vpop.f32.mrb[1].mxu1 }
 0x1fc   :  { %461 = vmatmul.mubr.f32.vlgmr.msra.gmra.mrb[2].mxu0 %v235_v58 }
 0x2cf   :  { %v318_v60 = vpop.f32.mrb[2].mxu0 }
 0x2d0   :  { %v348_v61 = vmul.f32 -1.442695, %v318_v60  ;;  %v462_v62 = vpop.f32.mrb[3].mxu0 }
 0x2d2   :  { %524 = vpow2.f32 %v348_v61 }
 0x2dc   :  { %v525_v63 = vpop.eup %524 }
 0x2dd   :  { %v325_v1 = vadd.f32 1.0, %v525_v63 }
 0x2df   :  { %526 = vrcp.f32 %v325_v1 }
 0x2e9   :  { %v527_v0 = vpop.eup %526 }
 0x2ea   :  { %329 = vst.msk [vmem:[#allocation10] sm:$0xff] %vm328_vm2, %v527_v0 }
 0x2eb   :  { %627 = shalt.err (!%p624_p8)
}
 0x2ec   :  { %s628_s1 = scalar_lea.hbm %s774_s4, 128 }
 0x2ed   :  { %p629_p9 = scmp.ne.s32.totalorder %s774_s4, %s628_s1  ;;  %p632_p10 = scmp.lt.u32.totalorder %s628_s1, %s774_s4 }
 0x2ef   :  { %p634_p11 = pnand %p632_p10, %p629_p9 }
 0x2f1   :  { %637 = shalt.err (!%p634_p11)
}
 0x2f2   :  { %339 = dma.vmem_to_hbm [thread:$0]  %s337_s25, 128, %s774_s4, [#allocation4]  }
 0x2f3   :  { %644 = dma.done.wait [#allocation4], 128  }
 0x2f4   :  { %645 = vsyncadd [#allocation4], 4294967168 }
 0x2f5   :  { %343 = vsyncpa [#allocation3], 1 }
 0x2f6   :  { %344 = vsyncpa [#allocation6], 1 }
 0x2f7   :  { %345 = vsyncpa [#allocation9], 1 }
 0x2f8   :  { %346 = vsyncpa [#allocation4], 1 }

</bundles_post_ra>
